<compile_context>
chip_gen: v7x
topology: tpu7x:2x2x1
jax: 0.10.0
libtpu: 0.0.40
codegen_flags: <defaults>
</compile_context>

<pallas_src>
import jax
import jax.numpy as jnp
from jax.experimental import pallas as pl
from jax.experimental.pallas import tpu as pltpu

H_IN, W_IN = 28, 28
C_IN = 3
C_MID = 32
C_OUT = 6
C_PAD = 8                     # output channels padded to a full sublane group
H_OUT, W_OUT = 14, 14         # after stride-2 1x1 conv; 3x3 pad-1 conv preserves it
PITCH = 16                    # padded spatial pitch (16 x 16 canvas per image)
BLOCK = PITCH * PITCH         # 256 pitched positions per batch item
MAX_SHIFT = 2 * PITCH + 2     # largest tap offset (kh=2, kw=2) = 34
ROWS = 8                      # augmented canvas rows: 3 chan + valid + ones + 3 zero
K_TOT = 9 * ROWS              # contraction size of the single fused matmul


def fused_conv_kernel(x_ref, w_ref, out_ref):
    # x_ref  : (8, lanes)  augmented pitched canvas, column q = n*256 + hp*16 + wp
    #          rows 0..2: input channels (zero outside the 14x14 image / tail)
    #          row  3   : 'valid' indicator (1 where conv1 output exists)
    #          row  4   : 'ones' (1 for q < q_total)     rows 5..7: zero
    # w_ref  : (8, 72)    combined weights, column index = tap*8 + row
    #          (tap, 0..2) = w2[tap] @ w1, (tap, 3) = w2[tap] @ b1,
    #          (tap0, 4) = b2, everything else 0; rows 6..7 zero (output pad).
    # out_ref: (8, q_total) channel-major pitched output (rows 6..7 are zeros)
    lanes = x_ref.shape[1]
    q_total = out_ref.shape[1]

    x = x_ref[...]                                           # (8, lanes)

    # 9 tap shifts of the whole canvas: tap (kh, kw) needs column q + kh*16 + kw.
    # Lane-roll left by `off` == roll right by (lanes - off); the wrapped lanes
    # land at q >= lanes - off >= q_total and are sliced away below.
    parts = []
    for kh in range(3):
        for kw in range(3):
            off = kh * PITCH + kw
            parts.append(x if off == 0 else pltpu.roll(x, lanes - off, axis=1))
    stacked = jnp.concatenate(parts, axis=0)[:, :q_total]    # (72, q_total)

    # Single MXU matmul = conv1 + conv2 (+ both biases via the valid/ones rows).
    t2 = jnp.dot(w_ref[...], stacked,
                 preferred_element_type=jnp.float32)         # (8, q_total)

    # hardswish-style epilogue: t2 * clamp(t2 + 3, 0, 6) / 6
    t5 = jnp.clip(t2 + 3.0, 0.0, 6.0)
    out_ref[...] = t2 * t5 * (1.0 / 6.0)


@jax.jit
def model_forward(x_nchw, w1, b1, w2, b2):
    n = x_nchw.shape[0]
    q_total = n * BLOCK
    lanes = ((q_total + MAX_SHIFT + 127) // 128) * 128       # lane-tile aligned
    assert lanes >= q_total + MAX_SHIFT                      # roll-wrap safety

    # --- input glue (few KiB; fuses into one XLA fusion) -------------------
    # conv1 stride-2, kernel-1, pad-0 == spatial subsample; place the 14x14
    # result on a zero 16x16 canvas (1px border) so conv2's pad=1 is implicit.
    x_sub = x_nchw[:, :, ::2, ::2]                            # (N, 3, 14, 14)
    x_pad = jnp.pad(x_sub, ((0, 0), (0, 0), (1, 1), (1, 1)))  # (N, 3, 16, 16)
    x_t = jnp.transpose(x_pad, (1, 0, 2, 3)).reshape(C_IN, q_total)

    hp = jnp.arange(PITCH)
    vline = ((hp >= 1) & (hp <= H_OUT)).astype(jnp.float32)   # canvas validity
    vmask = vline[:, None] * vline[None, :]                   # (16, 16)
    valid_row = jnp.tile(vmask.reshape(1, BLOCK), (1, n))     # (1, q_total)
    ones_row = jnp.ones((1, q_total), jnp.float32)
    zero_rows = jnp.zeros((ROWS - C_IN - 2, q_total), jnp.float32)
    x_aug = jnp.concatenate([x_t, valid_row, ones_row, zero_rows], axis=0)
    x_aug = jnp.pad(x_aug, ((0, 0), (0, lanes - q_total)))    # (8, lanes)

    # --- combined weights (conv2 ∘ conv1, biases folded in) ----------------
    w1m = w1.reshape(C_MID, C_IN)                             # (32, 3)
    w_eff = jnp.einsum('omkl,mc->kloc', w2, w1m)              # (3,3,6,3)
    b1col = jnp.einsum('omkl,m->klo', w2, b1)[..., None]      # (3,3,6,1)
    b2col = jnp.zeros((3, 3, C_OUT, 1), jnp.float32).at[0, 0, :, 0].set(b2)
    pad_cols = jnp.zeros((3, 3, C_OUT, ROWS - C_IN - 2), jnp.float32)
    blocks = jnp.concatenate([w_eff, b1col, b2col, pad_cols], axis=-1)  # (3,3,6,8)
    w_comb = blocks.transpose(2, 0, 1, 3).reshape(C_OUT, K_TOT)
    w_comb = jnp.pad(w_comb, ((0, C_PAD - C_OUT), (0, 0)))    # (8, 72)

    flops = 2 * C_PAD * K_TOT * q_total + 4 * C_PAD * q_total
    bytes_accessed = 4 * (ROWS * lanes + C_PAD * K_TOT + C_PAD * q_total)

    out = pl.pallas_call(
        fused_conv_kernel,
        out_shape=jax.ShapeDtypeStruct((C_PAD, q_total), jnp.float32),
        cost_estimate=pl.CostEstimate(flops=flops, transcendentals=0,
                                      bytes_accessed=bytes_accessed),
    )(x_aug, w_comb)                                          # (8, n*256)

    # --- output glue (single tiny fusion) ----------------------------------
    out = out[:C_OUT].reshape(C_OUT, n, PITCH, PITCH)[:, :, :H_OUT, :W_OUT]
    out = jnp.transpose(out, (1, 0, 2, 3))                    # (N, 6, 14, 14)
    return out[..., None]                                     # (N, 6, 14, 14, 1)


def reference_forward(x, w1, b1, w2, b2):
    # Pure-JAX reference of the torch module (torch op order) for self-check.
    xs = x[:, :, ::2, ::2]                                                # (N,3,14,14)
    t1 = jnp.einsum('oc,nchw->nohw', w1.reshape(C_MID, C_IN), xs)
    t1 = t1 + b1[None, :, None, None]
    t1p = jnp.pad(t1, ((0, 0), (0, 0), (1, 1), (1, 1)))
    t2 = jnp.zeros((x.shape[0], C_OUT, H_OUT, W_OUT), jnp.float32)
    for i in range(3):
        for j in range(3):
            t2 = t2 + jnp.einsum('oc,nchw->nohw', w2[:, :, i, j],
                                 t1p[:, :, i:i + H_OUT, j:j + W_OUT])
    t2 = t2 + b2[None, :, None, None]
    t5 = jnp.clip(t2 + 3.0, 0.0, 6.0)
    return (t2 * t5 / 6.0)[..., None]


if __name__ == "__main__":
    key = jax.random.PRNGKey(0)
    kx, kw1, kb1, kw2, kb2 = jax.random.split(key, 5)

    x1 = jax.random.normal(kx, (2, 3, 28, 28), dtype=jnp.float32)

    # Deterministic parameter init (shapes match the torch module's __init__)
    w1 = jax.random.normal(kw1, (32, 3, 1, 1), dtype=jnp.float32) * 0.1
    b1 = jax.random.normal(kb1, (32,), dtype=jnp.float32) * 0.1
    w2 = jax.random.normal(kw2, (6, 32, 3, 3), dtype=jnp.float32) * 0.1
    b2 = jax.random.normal(kb2, (6,), dtype=jnp.float32) * 0.1

    out = model_forward(x1, w1, b1, w2, b2)
    jax.block_until_ready(out)

    assert out.shape == (2, 6, 14, 14, 1), out.shape
    assert out.dtype == jnp.float32

    ref = reference_forward(x1, w1, b1, w2, b2)
    assert jnp.allclose(out, ref, atol=1e-3, rtol=1e-3), float(
        jnp.max(jnp.abs(out - ref)))

    print("KERNEL_OK")
</pallas_src>

<mosaic_0001>
module attributes {stable_mosaic.version = 11 : i64} {
  func.func @fused_conv_kernel(%arg0: memref<8x640xf32, #tpu.memory_space<vmem>>, %arg1: memref<8x72xf32, #tpu.memory_space<vmem>>, %arg2: memref<8x512xf32, #tpu.memory_space<vmem>>) attributes {dimension_semantics = [], scalar_prefetch = 0 : i64, scratch_operands = 0 : i64, tpu.core_type = #tpu.core_type<tc>} {
    %c0 = arith.constant 0 : index
    %c0_0 = arith.constant 0 : index
    %0 = vector.load %arg0[%c0, %c0_0] : memref<8x640xf32, #tpu.memory_space<vmem>>, vector<8x640xf32>
    %c639_i32 = arith.constant 639 : i32
    %1 = tpu.dynamic_rotate %0 by %c639_i32 dim 1 : vector<8x640xf32>, i32 -> vector<8x640xf32>
    %c638_i32 = arith.constant 638 : i32
    %2 = tpu.dynamic_rotate %0 by %c638_i32 dim 1 : vector<8x640xf32>, i32 -> vector<8x640xf32>
    %c624_i32 = arith.constant 624 : i32
    %3 = tpu.dynamic_rotate %0 by %c624_i32 dim 1 : vector<8x640xf32>, i32 -> vector<8x640xf32>
    %c623_i32 = arith.constant 623 : i32
    %4 = tpu.dynamic_rotate %0 by %c623_i32 dim 1 : vector<8x640xf32>, i32 -> vector<8x640xf32>
    %c622_i32 = arith.constant 622 : i32
    %5 = tpu.dynamic_rotate %0 by %c622_i32 dim 1 : vector<8x640xf32>, i32 -> vector<8x640xf32>
    %c608_i32 = arith.constant 608 : i32
    %6 = tpu.dynamic_rotate %0 by %c608_i32 dim 1 : vector<8x640xf32>, i32 -> vector<8x640xf32>
    %c607_i32 = arith.constant 607 : i32
    %7 = tpu.dynamic_rotate %0 by %c607_i32 dim 1 : vector<8x640xf32>, i32 -> vector<8x640xf32>
    %c606_i32 = arith.constant 606 : i32
    %8 = tpu.dynamic_rotate %0 by %c606_i32 dim 1 : vector<8x640xf32>, i32 -> vector<8x640xf32>
    %9 = tpu.concatenate %0, %1, %2, %3, %4, %5, %6, %7, %8 in 0 : vector<8x640xf32>, vector<8x640xf32>, vector<8x640xf32>, vector<8x640xf32>, vector<8x640xf32>, vector<8x640xf32>, vector<8x640xf32>, vector<8x640xf32>, vector<8x640xf32> -> vector<72x640xf32>
    %10 = vector.extract_strided_slice %9 {offsets = [0, 0], sizes = [72, 512], strides = [1, 1]} : vector<72x640xf32> to vector<72x512xf32>
    %c0_1 = arith.constant 0 : index
    %c0_2 = arith.constant 0 : index
    %11 = vector.load %arg1[%c0_1, %c0_2] : memref<8x72xf32, #tpu.memory_space<vmem>>, vector<8x72xf32>
    %cst = arith.constant dense<0.000000e+00> : vector<8x512xf32>
    %12 = tpu.matmul %11, %10, %cst {dimension_numbers = #tpu.dot_dimension_numbers<[1], [0], [0], [1], [0, 0, 1, 1], [], []>} : vector<8x72xf32>, vector<72x512xf32>, vector<8x512xf32> -> vector<8x512xf32>
    %cst_3 = arith.constant 3.000000e+00 : f32
    %13 = vector.broadcast %cst_3 : f32 to vector<8x512xf32>
    %14 = arith.addf %12, %13 : vector<8x512xf32>
    %cst_4 = arith.constant 0.000000e+00 : f32
    %cst_5 = arith.constant 6.000000e+00 : f32
    %15 = vector.broadcast %cst_4 : f32 to vector<8x512xf32>
    %16 = arith.maximumf %15, %14 : vector<8x512xf32>
    %17 = vector.broadcast %cst_5 : f32 to vector<8x512xf32>
    %18 = arith.minimumf %17, %16 : vector<8x512xf32>
    %19 = arith.mulf %12, %18 : vector<8x512xf32>
    %cst_6 = arith.constant 0.166666672 : f32
    %20 = vector.broadcast %cst_6 : f32 to vector<8x512xf32>
    %21 = arith.mulf %19, %20 : vector<8x512xf32>
    %c0_7 = arith.constant 0 : index
    %c0_8 = arith.constant 0 : index
    %22 = vector.load %arg2[%c0_7, %c0_8] : memref<8x512xf32, #tpu.memory_space<vmem>>, vector<8x512xf32>
    tpu.vector_store %arg2[%c0_7, %c0_8], %21 {strides = array<i32>} : memref<8x512xf32, #tpu.memory_space<vmem>>, vector<8x512xf32>,
    return
  }
}

</mosaic_0001>

<bundles_post_ra>
// kernel: model_forward.1
= control target key start
LH: loop header
LB: loop body
LE: loop exit
PB: predicated region body
PF: predicated region fallthrough
CT: control target
= control target key end

     0   :  { %s426_s15 = smov 127   ;;  %s427_s20 = smov 126   ;;  %v433_v7 = vmov 0.0   ;;  %v26_v8 = vlaneseq  ;;  %vm139_vm8 = vcmask 588800   ;;  %s575_s0 = inlined_call_operand.vmem [shape: f32[8,640], index: 0, kind: input, shape index: {}]   ;;  %s576_s1 = inlined_call_operand.vmem [shape: f32[8,72], index: 1, kind: input, shape index: {}]   ;;  %s577_s2 = inlined_call_operand.vmem [shape: f32[8,512], index: 2, kind: output, shape index: {}]  }
   0x1   :  { %v453_v0 = vld [vmem:[%s575_s0] sm:$0xff]  ;;  %v12_v1 = vld [vmem:[%s575_s0 + $0x8] sm:$0xff]  ;;  %v461_v2 = vld [vmem:[%s575_s0 + $0x10] sm:$0xff]  ;;  %s428_s21 = smov 112   ;;  %s429_s22 = smov 111   ;;  %207 = vmatprep.mubr.f32.mxu0 %v433_v7  ;;  %278 = vmatprep.mubr.f32.mxu1 %v433_v7 }
   0x2   :  { %16 = vrot.lane.b32.xlu1 %v453_v0, %s426_s15  ;;  %v356_v3 = vpack.i.bf16 %v461_v2, %v12_v1  ;;  %v468_v4 = vld [vmem:[%s575_s0 + $0x18] sm:$0xff]  ;;  %v15_v5 = vld [vmem:[%s575_s0 + $0x20] sm:$0xff]  ;;  %s430_s23 = smov 110   ;;  %s431_s0 = smov 96   ;;  %v483_v9 = vand.u32 127, %v26_v8 }
   0x3   :  { %v361_v6 = vpack.i.bf16 %v15_v5, %v468_v4  ;;  %s432_s24 = smov 95   ;;  %s434_s25 = smov 94  }
   0x4   :  { %357 = vrot.lane.b32.xlu0 %v356_v3, %s426_s15  ;;  %vm28_vm0 = vcmp.lt.s32.totalorder %v483_v9, 127  ;;  %vm43_vm1 = vcmp.lt.s32.totalorder %v483_v9, 126  ;;  %vm58_vm2 = vcmp.lt.s32.totalorder %v483_v9, 112  ;;  %vm73_vm3 = vcmp.lt.s32.totalorder %v483_v9, 111 }
   0x5   :  { %vm88_vm4 = vcmp.lt.s32.totalorder %v483_v9, 110  ;;  %vm103_vm5 = vcmp.lt.s32.totalorder %v483_v9, 96  ;;  %vm118_vm6 = vcmp.lt.s32.totalorder %v483_v9, 95  ;;  %vm133_vm7 = vcmp.lt.s32.totalorder %v483_v9, 94 }
   0x6   :  { %367 = vrot.lane.b32.xlu1 %v356_v3, %s427_s20 }
   0x8   :  { %362 = vrot.lane.b32.xlu0 %v361_v6, %s426_s15 }
   0xa   :  { %377 = vrot.lane.b32.xlu1 %v356_v3, %s428_s21 }
   0xc   :  { %372 = vrot.lane.b32.xlu0 %v361_v6, %s427_s20 }
   0xe   :  { %33 = vrot.lane.b32.xlu1 %v453_v0, %s427_s20 }
  0x10   :  { %382 = vrot.lane.b32.xlu0 %v361_v6, %s428_s21 }
  0x12   :  { %387 = vrot.lane.b32.xlu1 %v356_v3, %s429_s22 }
  0x14   :  { %48 = vrot.lane.b32.xlu0 %v453_v0, %s428_s21 }
  0x16   :  { %397 = vrot.lane.b32.xlu1 %v356_v3, %s430_s23 }
  0x18   :  { %392 = vrot.lane.b32.xlu0 %v361_v6, %s429_s22 }
  0x1a   :  { %63 = vrot.lane.b32.xlu1 %v453_v0, %s429_s22 }
  0x1c   :  { %402 = vrot.lane.b32.xlu0 %v361_v6, %s430_s23 }
  0x1e   :  { %407 = vrot.lane.b32.xlu1 %v356_v3, %s431_s0 }
  0x20   :  { %78 = vrot.lane.b32.xlu0 %v453_v0, %s430_s23 }
  0x22   :  { %417 = vrot.lane.b32.xlu1 %v356_v3, %s432_s24 }
  0x24   :  { %412 = vrot.lane.b32.xlu0 %v361_v6, %s431_s0 }
  0x26   :  { %93 = vrot.lane.b32.xlu1 %v453_v0, %s431_s0 }
  0x28   :  { %422 = vrot.lane.b32.xlu0 %v361_v6, %s432_s24 }
  0x2a   :  { %125 = vrot.lane.b32.xlu1 %v12_v1, %s434_s25 }
  0x2c   :  { %108 = vrot.lane.b32.xlu0 %v453_v0, %s432_s24 }
  0x2e   :  { %129 = vrot.lane.b32.xlu1 %v468_v4, %s434_s25 }
  0x30   :  { %127 = vrot.lane.b32.xlu0 %v461_v2, %s434_s25 }
  0x32   :  { %123 = vrot.lane.b32.xlu1 %v453_v0, %s434_s25 }
  0x34   :  { %131 = vrot.lane.b32.xlu0 %v15_v5, %s434_s25 }
  0x74   :  { %v17_v10 = vpop.permute.xlu1 %16 }
  0x76   :  { %v358_v11 = vpop.permute.xlu0 %357 }
  0x77   :  { %v360_v12 = vunpack.i.h.bf16 %v358_v11  ;;  %v359_v13 = vunpack.i.l.bf16 %v358_v11 }
  0x78   :  { %v368_v14 = vpop.permute.xlu1 %367 }
  0x79   :  { %v370_v15 = vunpack.i.h.bf16 %v368_v14  ;;  %v369_v16 = vunpack.i.l.bf16 %v368_v14  ;;  %v31_v17 = vsel %vm28_vm0, %v359_v13, %v360_v12  ;;  %v32_v18 = vsel %vm28_vm0, %v17_v10, %v359_v13 }
  0x7a   :  { %v363_v19 = vpop.permute.xlu0 %362  ;;  %v315_v20 = vpack.c.bf16 %v31_v17, %v12_v1  ;;  %v317_v21 = vpack.c.bf16 %v32_v18, %v453_v0 }
  0x7b   :  { %v365_v22 = vunpack.i.h.bf16 %v363_v19  ;;  %v364_v23 = vunpack.i.l.bf16 %v363_v19  ;;  %v46_v25 = vsel %vm43_vm1, %v369_v16, %v370_v15 }
  0x7c   :  { %316 = vmatprep.subr.bf16.mxu0 %v315_v20  ;;  %v378_v24 = vpop.permute.xlu1 %377 }
  0x7d   :  { %v380_v26 = vunpack.i.h.bf16 %v378_v24  ;;  %v379_v27 = vunpack.i.l.bf16 %v378_v24  ;;  %318 = vmatpush1.bf16.msra.mxu0 %v317_v21  ;;  %v29_v28 = vsel %vm28_vm0, %v364_v23, %v365_v22  ;;  %v30_v29 = vsel %vm28_vm0, %v360_v12, %v364_v23 }
  0x7e   :  { %v373_v30 = vpop.permute.xlu0 %372  ;;  %v331_v31 = vpack.c.bf16 %v29_v28, %v468_v4  ;;  %v333_v32 = vpack.c.bf16 %v30_v29, %v461_v2 }
  0x7f   :  { %v61_v33 = vsel %vm58_vm2, %v379_v27, %v380_v26  ;;  %v375_v34 = vunpack.i.h.bf16 %v373_v30  ;;  %v374_v35 = vunpack.i.l.bf16 %v373_v30 }
  0x80   :  { %332 = vmatprep.subr.bf16.mxu1 %v331_v31  ;;  %v34_v36 = vpop.permute.xlu1 %33  ;;  %v319_v37 = vpack.c.bf16 %v61_v33, %v46_v25 }
  0x81   :  { %334 = vmatpush1.bf16.msra.mxu1 %v333_v32  ;;  %v44_v42 = vsel %vm43_vm1, %v374_v35, %v375_v34  ;;  %v45_v43 = vsel %vm43_vm1, %v370_v15, %v374_v35  ;;  %v47_v51 = vsel %vm43_vm1, %v34_v36, %v369_v16 }
  0x82   :  { %v383_v38 = vpop.permute.xlu0 %382  ;;  %320 = vmatprep.subr.bf16.mxu0 %v319_v37 }
  0x83   :  { %v385_v39 = vunpack.i.h.bf16 %v383_v38  ;;  %v384_v40 = vunpack.i.l.bf16 %v383_v38 }
  0x84   :  { %v388_v41 = vpop.permute.xlu1 %387 }
  0x85   :  { %v390_v44 = vunpack.i.h.bf16 %v388_v41  ;;  %v389_v45 = vunpack.i.l.bf16 %v388_v41  ;;  %v59_v46 = vsel %vm58_vm2, %v384_v40, %v385_v39  ;;  %v60_v47 = vsel %vm58_vm2, %v380_v26, %v384_v40 }
  0x86   :  { %v49_v48 = vpop.permute.xlu0 %48  ;;  %v335_v49 = vpack.c.bf16 %v59_v46, %v44_v42  ;;  %v337_v50 = vpack.c.bf16 %v60_v47, %v45_v43 }
  0x87   :  { %v62_v52 = vsel %vm58_vm2, %v49_v48, %v379_v27  ;;  %v76_v57 = vsel %vm73_vm3, %v389_v45, %v390_v44 }
  0x88   :  { %v321_v53 = vpack.c.bf16 %v62_v52, %v47_v51  ;;  %336 = vmatprep.subr.bf16.mxu1 %v335_v49  ;;  %v398_v54 = vpop.permute.xlu1 %397 }
  0x89   :  { %v400_v55 = vunpack.i.h.bf16 %v398_v54  ;;  %v399_v56 = vunpack.i.l.bf16 %v398_v54  ;;  %338 = vmatpush1.bf16.msra.mxu1 %v337_v50 }
  0x8a   :  { %v393_v58 = vpop.permute.xlu0 %392  ;;  %322 = vmatpush1.bf16.msra.mxu0 %v321_v53 }
  0x8b   :  { %v91_v59 = vsel %vm88_vm4, %v399_v56, %v400_v55  ;;  %v395_v60 = vunpack.i.h.bf16 %v393_v58  ;;  %v394_v61 = vunpack.i.l.bf16 %v393_v58 }
  0x8c   :  { %v64_v62 = vpop.permute.xlu1 %63  ;;  %v323_v63 = vpack.c.bf16 %v91_v59, %v76_v57 }
  0x8d   :  { %v74_v4 = vsel %vm73_vm3, %v394_v61, %v395_v60  ;;  %v75_v5 = vsel %vm73_vm3, %v390_v44, %v394_v61  ;;  %v77_v14 = vsel %vm73_vm3, %v64_v62, %v389_v45  ;;  %v138_v45 = vld [vmem:[%s576_s1] sm:$0xff] }
  0x8e   :  { %v403_v0 = vpop.permute.xlu0 %402  ;;  %324 = vmatprep.subr.bf16.mxu0 %v323_v63 }
  0x8f   :  { %v405_v1 = vunpack.i.h.bf16 %v403_v0  ;;  %v404_v2 = vunpack.i.l.bf16 %v403_v0 }
  0x90   :  { %v408_v3 = vpop.permute.xlu1 %407 }
  0x91   :  { %v410_v6 = vunpack.i.h.bf16 %v408_v3  ;;  %v409_v7 = vunpack.i.l.bf16 %v408_v3  ;;  %v89_v8 = vsel %vm88_vm4, %v404_v2, %v405_v1  ;;  %v90_v10 = vsel %vm88_vm4, %v400_v55, %v404_v2 }
  0x92   :  { %v79_v11 = vpop.permute.xlu0 %78  ;;  %v339_v12 = vpack.c.bf16 %v89_v8, %v74_v4  ;;  %v341_v13 = vpack.c.bf16 %v90_v10, %v75_v5 }
  0x93   :  { %v92_v15 = vsel %vm88_vm4, %v79_v11, %v399_v56  ;;  %v106_v20 = vsel %vm103_vm5, %v409_v7, %v410_v6 }
  0x94   :  { %v325_v16 = vpack.c.bf16 %v92_v15, %v77_v14  ;;  %v418_v17 = vpop.permute.xlu1 %417  ;;  %340 = vmatprep.subr.bf16.mxu1 %v339_v12 }
  0x95   :  { %v420_v18 = vunpack.i.h.bf16 %v418_v17  ;;  %v419_v19 = vunpack.i.l.bf16 %v418_v17  ;;  %342 = vmatpush1.bf16.msra.mxu1 %v341_v13 }
  0x96   :  { %v413_v21 = vpop.permute.xlu0 %412  ;;  %326 = vmatpush1.bf16.msra.mxu0 %v325_v16 }
  0x97   :  { %v121_v22 = vsel %vm118_vm6, %v419_v19, %v420_v18  ;;  %v415_v25 = vunpack.i.h.bf16 %v413_v21  ;;  %v414_v26 = vunpack.i.l.bf16 %v413_v21 }
  0x98   :  { %v94_v23 = vpop.permute.xlu1 %93  ;;  %v327_v24 = vpack.c.bf16 %v121_v22, %v106_v20 }
  0x99   :  { %v104_v31 = vsel %vm103_vm5, %v414_v26, %v415_v25  ;;  %v105_v33 = vsel %vm103_vm5, %v410_v6, %v414_v26  ;;  %v107_v38 = vsel %vm103_vm5, %v94_v23, %v409_v7 }
  0x9a   :  { %v423_v27 = vpop.permute.xlu0 %422  ;;  %328 = vmatprep.subr.bf16.mxu0 %v327_v24 }
  0x9b   :  { %v425_v28 = vunpack.i.h.bf16 %v423_v27  ;;  %v424_v29 = vunpack.i.l.bf16 %v423_v27 }
  0x9c   :  { %v126_v30 = vpop.permute.xlu1 %125 }
  0x9d   :  { %v119_v32 = vsel %vm118_vm6, %v424_v29, %v425_v28  ;;  %v120_v34 = vsel %vm118_vm6, %v420_v18, %v424_v29 }
  0x9e   :  { %v109_v35 = vpop.permute.xlu0 %108  ;;  %v343_v36 = vpack.c.bf16 %v119_v32, %v104_v31  ;;  %v345_v37 = vpack.c.bf16 %v120_v34, %v105_v33 }
  0x9f   :  { %v122_v39 = vsel %vm118_vm6, %v109_v35, %v419_v19 }
  0xa0   :  { %v329_v40 = vpack.c.bf16 %v122_v39, %v107_v38  ;;  %v130_v41 = vpop.permute.xlu1 %129  ;;  %344 = vmatprep.subr.bf16.mxu1 %v343_v36 }
  0xa1   :  { %346 = vmatpush1.bf16.msra.mxu1 %v345_v37 }
  0xa2   :  { %v128_v42 = vpop.permute.xlu0 %127  ;;  %330 = vmatpush1.bf16.msra.mxu0 %v329_v40 }
  0xa3   :  { %v136_v43 = vsel %vm133_vm7, %v126_v30, %v128_v42  ;;  %v135_v49 = vsel %vm133_vm7, %v128_v42, %v130_v41 }
  0xa4   :  { %v124_v44 = vpop.permute.xlu1 %123  ;;  %159 = vmatprep.subr.mxu0 %v136_v43 }
  0xa5   :  { %v137_v46 = vsel %vm133_vm7, %v124_v44, %v126_v30 }
  0xa6   :  { %v132_v47 = vpop.permute.xlu0 %131  ;;  %160 = vmatpush1.msra.mxu0 %v137_v46 }
  0xa7   :  { %313 = vmatmul.mubr.msk.f32.vlgmr.msra.gmra.mrb[0].mxu0 %vm139_vm8, %v138_v45  ;;  %v134_v48 = vsel %vm133_vm7, %v130_v41, %v132_v47 }
  0xa8   :  { %230 = vmatprep.subr.mxu1 %v134_v48 }
  0xa9   :  { %231 = vmatpush1.msra.mxu1 %v135_v49 }
  0xaa   :  { %314 = vmatmul.mubr.msk.f32.vlgmr.msra.gmra.mrb[0].mxu1 %vm139_vm8, %v138_v45 }
 0x17a   :  { %v209_v50 = vpop.f32.mrb[0].mxu0 }
 0x17b   :  { %v285_v51 = vadd.f32 3.0, %v209_v50  ;;  %v211_v52 = vpop.f32.mrb[1].mxu0 }
 0x17c   :  { %v286_v53 = vadd.f32 3.0, %v211_v52 }
 0x17d   :  { %v289_v54 = vmax.f32 %v285_v51, 0.0  ;;  %v280_v55 = vpop.f32.mrb[0].mxu1 }
 0x17e   :  { %v290_v56 = vmax.f32 %v286_v53, 0.0  ;;  %v287_v57 = vadd.f32 3.0, %v280_v55  ;;  %v282_v58 = vpop.f32.mrb[1].mxu1 }
 0x17f   :  { %v293_v59 = vmin.f32 %v289_v54, 6.0  ;;  %v288_v60 = vadd.f32 3.0, %v282_v58 }
 0x180   :  { %v294_v61 = vmin.f32 %v290_v56, 6.0  ;;  %v291_v62 = vmax.f32 %v287_v57, 0.0 }
 0x181   :  { %v297_v63 = vmul.f32 %v293_v59, %v209_v50  ;;  %v292_v0 = vmax.f32 %v288_v60, 0.0 }
 0x182   :  { %v298_v1 = vmul.f32 %v294_v61, %v211_v52  ;;  %v295_v9 = vmin.f32 %v291_v62, 6.0 }
 0x183   :  { %v301_v2 = vmul.f32 0.16666667, %v297_v63  ;;  %v296_v3 = vmin.f32 %v292_v0, 6.0 }
 0x184   :  { %v302_v4 = vmul.f32 0.16666667, %v298_v1  ;;  %v299_v5 = vmul.f32 %v295_v9, %v280_v55 }
 0x185   :  { %305 = vst [vmem:[%s577_s2] sm:$0xff] %v301_v2  ;;  %v300_v6 = vmul.f32 %v296_v3, %v282_v58 }
 0x186   :  { %306 = vst [vmem:[%s577_s2 + $0x8] sm:$0xff] %v302_v4  ;;  %v303_v7 = vmul.f32 0.16666667, %v299_v5 }
 0x187   :  { %v304_v8 = vmul.f32 0.16666667, %v300_v6 }
 0x188   :  { %307 = vst [vmem:[%s577_s2 + $0x10] sm:$0xff] %v303_v7 }
 0x189   :  { %308 = vst [vmem:[%s577_s2 + $0x18] sm:$0xff] %v304_v8 }

</bundles_post_ra>
